<compile_context>
chip_gen: v6e
topology: v6e:2x2x1
jax: 0.10.0
libtpu: 0.0.40
codegen_flags: <defaults>
</compile_context>

<pallas_src>
import functools

import jax
import jax.numpy as jnp
from jax.experimental import pallas as pl
from jax.experimental.pallas import tpu as pltpu


# --------------------------------------------------------------------------- #
# Helpers
# --------------------------------------------------------------------------- #
def _round_up(x, m):
    return ((x + m - 1) // m) * m


def _itemsize(dt):
    return jnp.dtype(dt).itemsize


def _pick_tile(d_pad, want):
    """Largest multiple of 128 that divides d_pad and is <= want (>= 128)."""
    t = max(128, (min(want, d_pad) // 128) * 128)
    while d_pad % t != 0:
        t -= 128
    return t


def _pick_tm(m, want, max_ratio=1.1):
    """Row tile: multiple of 8, as large as possible while bounding pad waste.

    Padded rows are real MXU work and real DMA bytes that get sliced away, so
    shrink tm (preferring 256/128-aligned sizes) until m_pad <= ~1.1 * m.
    """
    want = max(8, int(want))
    m8 = _round_up(m, 8)
    if m8 <= want:
        return m8
    for step in (256, 128, 8):
        tm = (want // step) * step
        while tm >= step:
            if _round_up(m, tm) <= max_ratio * m:
                return tm
            tm -= step
    return 8


def _vmem_capacity_bytes():
    """Physical VMEM (128 MiB v5e/v6e, 64 MiB per-core v7x); safe fallback."""
    try:
        return int(pltpu.get_tpu_info().vmem_capacity_bytes)
    except Exception:
        return 64 * 1024 * 1024


def _vmem_limit(footprint, cap, override):
    if override is not None:
        return int(override)
    # Enough for the tiles + compiler scratch headroom, but below the physical
    # ceiling (important on v7x where it is only 64 MiB).
    return int(min(max(cap - 8 * 2**20, 16 * 2**20),
                   max(footprint + 16 * 2**20, 32 * 2**20)))


# --------------------------------------------------------------------------- #
# Kernels
# --------------------------------------------------------------------------- #
def _residual_linear_single_kernel(x_ref, w_ref, b_ref, o_ref, *, cast_to):
    """Pure M-tiled GEMM: o = x @ W + b + x (no K/N tiling).

    x_ref doubles as matmul LHS and residual (one HBM fetch, no wrapper-side
    cast pass); the operand cast rides a free VALU slot under the MXU.
    """
    x = x_ref[...]
    lhs = x if cast_to is None else x.astype(cast_to)
    acc = jnp.dot(lhs, w_ref[...], preferred_element_type=jnp.float32)
    o_ref[...] = (acc + b_ref[...] + x.astype(jnp.float32)).astype(o_ref.dtype)


def _residual_linear_tiled_kernel(x_ref, w_ref, b_ref, r_ref, o_ref, acc_ref):
    """One (tm, tn) output tile; K reduction runs along grid axis 2.

    x_ref: (tm, tk) LHS tile (possibly bf16)
    w_ref: (tk, tn) weight tile (possibly bf16)
    b_ref: (1, tn)  bias (f32)
    r_ref: (tm, tn) residual x tile (original dtype)
    o_ref: (tm, tn) output tile
    acc_ref: (tm, tn) f32 accumulator scratch
    """
    k = pl.program_id(2)

    @pl.when(k == 0)
    def _():
        # Fold bias + residual into the accumulator init: both full-tile adds
        # hide under the first (MXU-bound) K step instead of lengthening the
        # last-step pipeline drain.
        acc_ref[...] = r_ref[...].astype(jnp.float32) + b_ref[...]

    acc_ref[...] += jnp.dot(
        x_ref[...], w_ref[...], preferred_element_type=jnp.float32
    )

    @pl.when(k == pl.num_programs(2) - 1)
    def _():
        o_ref[...] = acc_ref[...].astype(o_ref.dtype)


# --------------------------------------------------------------------------- #
# Wrapper
# --------------------------------------------------------------------------- #
def residual_linear(
    x,
    w,
    b,
    *,
    tm=1024,
    tn=512,
    tk=512,
    compute_dtype=jnp.bfloat16,   # MXU operand dtype (accumulation stays f32)
    single_block=None,            # None = auto (VMEM budget + grid heuristics)
    w_buffers=None,               # e.g. 3 -> pl.Buffered(3) on the W spec
    vmem_limit_bytes=None,        # None = derive from the tile footprint
):
    """Computes fn(x) + x with fn = Linear(dim, dim), fused in Pallas.

    x: (batch, seq, dim)   w: (dim, dim)   b: (dim,)
    """
    batch, seq, dim = x.shape
    out_dtype = x.dtype
    m = batch * seq

    lhs_dtype = jnp.dtype(x.dtype) if compute_dtype is None else jnp.dtype(compute_dtype)
    w_dtype = jnp.dtype(w.dtype) if compute_dtype is None else jnp.dtype(compute_dtype)

    # ---- pad to MXU / vreg friendly shapes ---------------------------------
    d_pad = _round_up(dim, 128)          # lane-dense last dim
    tm = _pick_tm(m, tm)                 # bound padded-row waste to ~10%
    m_pad = _round_up(m, tm)

    x2 = x.reshape(m, dim)
    if (m_pad, d_pad) != (m, dim):
        x2 = jnp.pad(x2, ((0, m_pad - m), (0, d_pad - dim)))
    w2 = w if d_pad == dim else jnp.pad(w, ((0, d_pad - dim), (0, d_pad - dim)))
    w2 = w2.astype(w_dtype)              # one-time operand-dtype weight
    b2 = b if d_pad == dim else jnp.pad(b, (0, d_pad - dim))
    b2 = b2.astype(jnp.float32).reshape(1, d_pad)

    # ---- VMEM budgeting -----------------------------------------------------
    cap = _vmem_capacity_bytes()
    tile_budget = max(cap - 24 * 2**20, 24 * 2**20)   # leave compiler headroom

    xb, wb, ob, lb = (_itemsize(x.dtype), _itemsize(w_dtype),
                      _itemsize(out_dtype), _itemsize(lhs_dtype))
    grid_m = m_pad // tm

    def single_footprint(tm_):
        return (2 * tm_ * d_pad * xb          # x tile (LHS + residual)
                + 2 * d_pad * d_pad * wb      # full weight
                + 2 * d_pad * 4               # bias
                + 2 * tm_ * d_pad * ob)       # output tile

    def tiled_footprint(tm_, tn_, tk_):
        return (2 * tm_ * tk_ * lb            # LHS tile
                + 2 * tk_ * tn_ * wb          # weight tile
                + 2 * tm_ * tn_ * xb          # residual tile
                + 2 * tn_ * 4                 # bias
                + 2 * tm_ * tn_ * ob          # output tile
                + tm_ * tn_ * 4)              # f32 accumulator scratch

    if single_block is None:
        # Single-block path only when the full weight fits the budget, and
        # only if a parallel grid axis with extent >= 2 survives (v7x has two
        # TensorCores; if grid_m == 1 the j axis must provide the parallelism).
        single_block = (single_footprint(tm) <= tile_budget
                        and (grid_m >= 2 or d_pad < 256))

    # ---- single-block path: pure M-tiled GEMM, no K loop --------------------
    if single_block:
        footprint = single_footprint(tm)
        vmem_limit = _vmem_limit(footprint, cap, vmem_limit_bytes)
        kernel = functools.partial(
            _residual_linear_single_kernel,
            cast_to=None if lhs_dtype == jnp.dtype(x.dtype) else lhs_dtype,
        )
        out2 = pl.pallas_call(
            kernel,
            out_shape=jax.ShapeDtypeStruct((m_pad, d_pad), out_dtype),
            grid_spec=pltpu.PrefetchScalarGridSpec(
                num_scalar_prefetch=0,
                grid=(grid_m,),
                in_specs=[
                    pl.BlockSpec((tm, d_pad), lambda i: (i, 0)),      # x
                    pl.BlockSpec((d_pad, d_pad), lambda i: (0, 0)),   # W (resident)
                    pl.BlockSpec((1, d_pad), lambda i: (0, 0)),       # bias
                ],
                out_specs=pl.BlockSpec((tm, d_pad), lambda i: (i, 0)),
            ),
            compiler_params=pltpu.CompilerParams(
                dimension_semantics=("parallel",),
                vmem_limit_bytes=vmem_limit,
            ),
        )(x2, w2, b2)

    # ---- general path: K/N tiling + f32 accumulator --------------------------
    else:
        tn = _pick_tile(d_pad, tn)
        tk = _pick_tile(d_pad, tk)
        if grid_m == 1 and d_pad // tn < 2:
            # Keep a parallel axis of extent >= 2 for the second core (v7x).
            tn = _pick_tile(d_pad, d_pad // 2)
        # Shrink tiles until the footprint fits the per-chip VMEM budget.
        while tiled_footprint(tm, tn, tk) > tile_budget:
            if tk > 128:
                tk = _pick_tile(d_pad, tk // 2)
            elif tn > 128:
                tn = _pick_tile(d_pad, tn // 2)
            elif tm > 128:
                tm = max(128, tm // 2)        # halving keeps m_pad % tm == 0
            else:
                break
        grid = (m_pad // tm, d_pad // tn, d_pad // tk)

        footprint = tiled_footprint(tm, tn, tk)
        vmem_limit = _vmem_limit(footprint, cap, vmem_limit_bytes)

        # LHS is re-fetched d_pad/tn times here -> external cast pays for its
        # single extra HBM pass by halving those DMA bytes.
        x_lhs = x2 if lhs_dtype == jnp.dtype(x.dtype) else x2.astype(lhs_dtype)

        w_spec_kwargs = {}
        if w_buffers is not None and w_buffers > 2:
            w_spec_kwargs = dict(pipeline_mode=pl.Buffered(w_buffers))

        out2 = pl.pallas_call(
            _residual_linear_tiled_kernel,
            out_shape=jax.ShapeDtypeStruct((m_pad, d_pad), out_dtype),
            grid_spec=pltpu.PrefetchScalarGridSpec(
                num_scalar_prefetch=0,
                grid=grid,
                in_specs=[
                    pl.BlockSpec((tm, tk), lambda i, j, k: (i, k)),             # x (LHS)
                    pl.BlockSpec((tk, tn), lambda i, j, k: (k, j),              # W tile
                                 **w_spec_kwargs),
                    pl.BlockSpec((1, tn), lambda i, j, k: (0, j)),              # bias
                    pl.BlockSpec((tm, tn), lambda i, j, k: (i, j)),             # x (residual)
                ],
                out_specs=pl.BlockSpec((tm, tn), lambda i, j, k: (i, j)),
                scratch_shapes=[pltpu.VMEM((tm, tn), jnp.float32)],
            ),
            compiler_params=pltpu.CompilerParams(
                dimension_semantics=("parallel", "parallel", "arbitrary"),
                vmem_limit_bytes=vmem_limit,
            ),
        )(x_lhs, w2, b2, x2)

    out2 = out2[:m, :dim]
    return out2.reshape(batch, seq, dim)


# --------------------------------------------------------------------------- #
# Self-test
# --------------------------------------------------------------------------- #
if __name__ == "__main__":
    key = jax.random.PRNGKey(0)
    kx, kw, kb, kx2, kw2, kb2 = jax.random.split(key, 6)

    batch, seq, dim = 2, 8, 32
    x = jax.random.normal(kx, (batch, seq, dim), dtype=jnp.float32)
    w = jax.random.normal(kw, (dim, dim), dtype=jnp.float32) * (1.0 / dim ** 0.5)
    b = jax.random.normal(kb, (dim,), dtype=jnp.float32) * 0.01

    # Pure-JAX reference of Residual(Linear)(x) = x @ W + b + x
    ref = jnp.einsum("bsd,de->bse", x, w) + b + x

    # 1) Default path: bf16 MXU operands (f32 accumulation, exact f32 bias/residual).
    out = residual_linear(x, w, b)
    jax.block_until_ready(out)
    assert out.shape == x.shape and out.dtype == x.dtype
    assert jnp.allclose(out, ref, atol=5e-2, rtol=5e-2), "bf16 default path mismatch"

    # 2) Exact f32 path.
    out_f32 = residual_linear(x, w, b, compute_dtype=None)
    jax.block_until_ready(out_f32)
    assert jnp.allclose(out_f32, ref, atol=1e-5, rtol=1e-5), "f32 path mismatch"

    # 3) K/N-tiled path (forced), under jit, larger dim -> exercises the f32
    #    accumulator, bias/residual fold, and the external LHS bf16 cast.
    dim2 = 256
    x_b = jax.random.normal(kx2, (batch, seq, dim2), dtype=jnp.float32)
    w_b = jax.random.normal(kw2, (dim2, dim2), dtype=jnp.float32) * (1.0 / dim2 ** 0.5)
    b_b = jax.random.normal(kb2, (dim2,), dtype=jnp.float32) * 0.01
    ref_b = jnp.einsum("bsd,de->bse", x_b, w_b) + b_b + x_b
    tiled_fn = jax.jit(functools.partial(residual_linear,
                                         single_block=False, tn=128, tk=128))
    out_b = tiled_fn(x_b, w_b, b_b)
    jax.block_until_ready(out_b)
    assert out_b.shape == x_b.shape and out_b.dtype == x_b.dtype
    assert jnp.allclose(out_b, ref_b, atol=5e-2, rtol=5e-2), "tiled path mismatch"

    # 4) Non-tile-divisible M exercises the row-padding path (exact f32).
    x3 = x[:, :7, :]
    out3 = residual_linear(x3, w, b, compute_dtype=None)
    jax.block_until_ready(out3)
    ref3 = jnp.einsum("bsd,de->bse", x3, w) + b + x3
    assert jnp.allclose(out3, ref3, atol=1e-5, rtol=1e-5), "padded-M mismatch"

    print("KERNEL_OK")
</pallas_src>

<mosaic_0001>
module attributes {stable_mosaic.version = 11 : i64} {
  func.func @_residual_linear_single_kernel(%arg0: i32, %arg1: memref<16x128xf32, #tpu.memory_space<vmem>>, %arg2: memref<128x128xbf16, #tpu.memory_space<vmem>>, %arg3: memref<1x128xf32, #tpu.memory_space<vmem>>, %arg4: memref<16x128xf32, #tpu.memory_space<vmem>>) attributes {dimension_semantics = [#tpu.dimension_semantics<parallel>], iteration_bounds = array<i64: 1>, scalar_prefetch = 0 : i64, scratch_operands = 0 : i64, tpu.core_type = #tpu.core_type<tc>, window_params = [{transform_indices = @transform_0, window_bounds = array<i64: 16, 128>}, {pipeline_mode = #tpu.pipeline_mode<synchronous>, transform_indices = @transform_1, window_bounds = array<i64: 128, 128>}, {pipeline_mode = #tpu.pipeline_mode<synchronous>, transform_indices = @transform_2, window_bounds = array<i64: 1, 128>}, {transform_indices = @transform_3, window_bounds = array<i64: 16, 128>}]} {
    %c0 = arith.constant 0 : index
    %c0_0 = arith.constant 0 : index
    %0 = vector.load %arg1[%c0, %c0_0] : memref<16x128xf32, #tpu.memory_space<vmem>>, vector<16x128xf32>
    %1 = arith.truncf %0 : vector<16x128xf32> to vector<16x128xbf16>
    %c0_1 = arith.constant 0 : index
    %c0_2 = arith.constant 0 : index
    %2 = vector.load %arg2[%c0_1, %c0_2] : memref<128x128xbf16, #tpu.memory_space<vmem>>, vector<128x128xbf16>
    %cst = arith.constant dense<0.000000e+00> : vector<16x128xf32>
    %3 = tpu.matmul %1, %2, %cst {dimension_numbers = #tpu.dot_dimension_numbers<[1], [0], [0], [1], [0, 0, 1, 1], [], []>} : vector<16x128xbf16>, vector<128x128xbf16>, vector<16x128xf32> -> vector<16x128xf32>
    %c0_3 = arith.constant 0 : index
    %c0_4 = arith.constant 0 : index
    %4 = vector.load %arg3[%c0_3, %c0_4] : memref<1x128xf32, #tpu.memory_space<vmem>>, vector<1x128xf32>
    %5 = vector.broadcast %4 : vector<1x128xf32> to vector<16x128xf32>
    %6 = arith.addf %3, %5 : vector<16x128xf32>
    %7 = arith.addf %6, %0 : vector<16x128xf32>
    %c0_5 = arith.constant 0 : index
    %c0_6 = arith.constant 0 : index
    %8 = vector.load %arg4[%c0_5, %c0_6] : memref<16x128xf32, #tpu.memory_space<vmem>>, vector<16x128xf32>
    tpu.vector_store %arg4[%c0_5, %c0_6], %7 {strides = array<i32>} : memref<16x128xf32, #tpu.memory_space<vmem>>, vector<16x128xf32>,
    return
  }
  func.func @transform_0(%arg0: i32) -> (i32, i32) {
    %c0_i32 = arith.constant 0 : i32
    %c0_i32_0 = arith.constant 0 : i32
    return %arg0, %c0_i32 : i32, i32
  }
  func.func @transform_1(%arg0: i32) -> (i32, i32) {
    %c0_i32 = arith.constant 0 : i32
    %c0_i32_0 = arith.constant 0 : i32
    %c0_i32_1 = arith.constant 0 : i32
    return %c0_i32, %c0_i32_0 : i32, i32
  }
  func.func @transform_2(%arg0: i32) -> (i32, i32) {
    %c0_i32 = arith.constant 0 : i32
    %c0_i32_0 = arith.constant 0 : i32
    %c0_i32_1 = arith.constant 0 : i32
    return %c0_i32, %c0_i32_0 : i32, i32
  }
  func.func @transform_3(%arg0: i32) -> (i32, i32) {
    %c0_i32 = arith.constant 0 : i32
    %c0_i32_0 = arith.constant 0 : i32
    return %arg0, %c0_i32 : i32, i32
  }
}

</mosaic_0001>

<bundles_post_ra>
// kernel: tpu_custom_call.1
= control target key start
LH: loop header
LB: loop body
LE: loop exit
PB: predicated region body
PF: predicated region fallthrough
CT: control target
= control target key end

     0   :  { %8 = vsyncpa [#allocation3], 0  ;;  %s349_s0 = inlined_call_operand.hbm [shape: f32[16,128], index: 0, kind: input, shape index: {}]   ;;  %s350_s1 = inlined_call_operand.hbm [shape: bf16[128,128], index: 1, kind: input, shape index: {}]   ;;  %s351_s2 = inlined_call_operand.vmem [shape: f32[1,128], index: 2, kind: input, shape index: {}]   ;;  %s352_s3 = inlined_call_operand.hbm [shape: f32[16,128], index: 3, kind: output, shape index: {}]  }
   0x1   :  { %9 = vsyncpa [#allocation6], 0 }
   0x2   :  { %10 = vsyncpa [#allocation4], 0  ;;  %s302_s12 = smov [#allocation2]  }
   0x3   :  { %s16_s13 = sshll.u32 %s302_s12, 4  ;;  %s17_s13 = int_to_ptr.vmem [resolvable:$true] %s16_s13 }
   0x4   :  { %s244_s14 = scalar_lea.vmem %s17_s13, 256  ;;  %p249_p1 = scmp.lt.s32.totalorder %s17_s13, %s17_s13 }
   0x5   :  { %p245_p0 = scmp.ne.s32.totalorder %s17_s13, %s244_s14  ;;  %p250_p2 = scmp.lt.s32.totalorder %s244_s14, %s244_s14 }
   0x7   :  { %p251_p3 = por %p250_p2, %p249_p1 }
   0x9   :  { %p252_p4 = pnand %p251_p3, %p245_p0 }
   0xb   :  { %255 = shalt.err (!%p252_p4)
}
   0xc   :  { %s303_s15 = smov 128   ;;  %s304_s16 = smov 8  }
   0xd   :  { %22 = dma.hbm_to_vmem [thread:$0]  %s349_s0, 256, %s17_s13, [#allocation3], %s303_s15, %s303_s15, %s304_s16  }
   0xe   :  { %s305_s19 = smov [#allocation5]  }
   0xf   :  { %s28_s20 = sshll.u32 %s305_s19, 4  ;;  %s29_s20 = int_to_ptr.vmem [resolvable:$true] %s28_s20 }
  0x10   :  { %s264_s21 = scalar_lea.vmem %s29_s20, 1024  ;;  %p269_p6 = scmp.lt.s32.totalorder %s29_s20, %s29_s20 }
  0x11   :  { %p265_p5 = scmp.ne.s32.totalorder %s29_s20, %s264_s21  ;;  %p270_p7 = scmp.lt.s32.totalorder %s264_s21, %s264_s21 }
  0x13   :  { %p271_p8 = por %p270_p7, %p269_p6 }
  0x15   :  { %p272_p9 = pnand %p271_p8, %p265_p5 }
  0x17   :  { %275 = shalt.err (!%p272_p9)
}
  0x18   :  { %s306_s22 = smov 64   ;;  %s307_s23 = smov 4  }
  0x19   :  { %34 = dma.hbm_to_vmem [thread:$0]  %s350_s1, 1024, %s29_s20, [#allocation6], %s306_s22, %s306_s22, %s307_s23  }
  0x1a   :  { %296 = dma.done.wait [#allocation3], 256  }
  0x1b   :  { %297 = vsyncadd [#allocation3], 4294967040 }
  0x1c   :  { %298 = dma.done.wait [#allocation6], 1024  }
  0x1d   :  { %299 = vsyncadd [#allocation6], 4294966272  ;;  %v308_v0 = vmov 0.0   ;;  %vm309_vm0 = vmmov 0   ;;  %v228_v1 = vld [vmem:[#allocation5 + $0x38] sm:$0xff]   ;;  %v229_v2 = vld [vmem:[#allocation5 + $0x30] sm:$0xff]  }
  0x1e   :  { %199 = vmatprep.subr.bf16.mxu0 %v308_v0  ;;  %215 = vmatprep.mubr.msk.bf16.mxu0 %vm309_vm0, %v308_v0  ;;  %v230_v3 = vld [vmem:[#allocation5 + $0x28] sm:$0xff]   ;;  %v231_v4 = vld [vmem:[#allocation5 + $0x20] sm:$0xff]   ;;  %v232_v5 = vld [vmem:[#allocation5 + $0x18] sm:$0xff]   ;;  %s310_s26 = smov [#allocation7]  }
  0x1f   :  { %200 = vmatpush3.bf16.msra.mxu0 %v228_v1  ;;  %v233_v6 = vld [vmem:[#allocation5 + $0x10] sm:$0xff]   ;;  %v234_v7 = vld [vmem:[#allocation5 + $0x8] sm:$0xff]   ;;  %v235_v8 = vld [vmem:[#allocation5] sm:$0xff]   ;;  %s168_s27 = sshll.u32 %s310_s26, 4  ;;  %s169_s27 = int_to_ptr.vmem [resolvable:$true] %s168_s27 }
  0x20   :  { %201 = vmatprep.subr.bf16.mxu0 %v308_v0  ;;  %v44_v9 = vld [vmem:[#allocation2] sm:$0xff]  ;;  %v45_v10 = vld [vmem:[#allocation2 + $0x8] sm:$0xff]  ;;  %s276_s28 = scalar_lea.vmem %s169_s27, 256  ;;  %p281_p11 = scmp.lt.s32.totalorder %s169_s27, %s169_s27 }
  0x21   :  { %v46_v11 = vpack.c.bf16 %v45_v10, %v44_v9  ;;  %v181_v12 = vld [vmem:[%s351_s2] ss:$0 sm:$0xff]  ;;  %p277_p10 = scmp.ne.s32.totalorder %s169_s27, %s276_s28  ;;  %p282_p12 = scmp.lt.s32.totalorder %s276_s28, %s276_s28 }
  0x23   :  { %202 = vmatpush3.bf16.msra.mxu0 %v229_v2  ;;  %p283_p13 = por %p282_p12, %p281_p11 }
  0x24   :  { %203 = vmatprep.subr.bf16.mxu0 %v308_v0 }
  0x25   :  { %p284_p0 = pnand %p283_p13, %p277_p10 }
  0x27   :  { %204 = vmatpush3.bf16.msra.mxu0 %v230_v3 }
  0x28   :  { %205 = vmatprep.subr.bf16.mxu0 %v308_v0 }
  0x2b   :  { %206 = vmatpush3.bf16.msra.mxu0 %v231_v4 }
  0x2c   :  { %207 = vmatprep.subr.bf16.mxu0 %v308_v0 }
  0x2f   :  { %208 = vmatpush3.bf16.msra.mxu0 %v232_v5 }
  0x30   :  { %209 = vmatprep.subr.bf16.mxu0 %v308_v0 }
  0x33   :  { %210 = vmatpush3.bf16.msra.mxu0 %v233_v6 }
  0x34   :  { %211 = vmatprep.subr.bf16.mxu0 %v308_v0 }
  0x37   :  { %212 = vmatpush3.bf16.msra.mxu0 %v234_v7 }
  0x38   :  { %213 = vmatprep.subr.bf16.mxu0 %v308_v0 }
  0x3b   :  { %214 = vmatpush3.bf16.msra.mxu0 %v235_v8 }
  0x3e   :  { %216 = vmatmul.mubr.bf16.vlgmr.msra.gmra.mxu0 %v46_v11 }
  0xfe   :  { %v152_v13 = vpop.f32.mrf.mxu0 }
  0xff   :  { %v153_v14 = vadd.f32 %v181_v12, %v152_v13 }
 0x100   :  { %v217_v15 = vpop.f32.mrf.mxu0 }
 0x101   :  { %v159_v16 = vadd.f32 %v153_v14, %v44_v9 }
 0x102   :  { %v155_v17 = vpop.f32.mrf.mxu0 }
 0x103   :  { %161 = vst [vmem:[#allocation7] sm:$0xff] %v159_v16  ;;  %v156_v18 = vadd.f32 %v181_v12, %v155_v17 }
 0x104   :  { %v218_v19 = vpop.f32.mrf.mxu0 }
 0x105   :  { %v160_v20 = vadd.f32 %v156_v18, %v45_v10 }
 0x107   :  { %162 = vst [vmem:[#allocation7 + $0x8] sm:$0xff] %v160_v20 }
 0x108   :  { %287 = shalt.err (!%p284_p0)
}
 0x109   :  { %174 = dma.vmem_to_hbm [thread:$0]  %s169_s27, 256, %s352_s3, [#allocation4], %s303_s15, %s303_s15, %s304_s16  }
 0x10a   :  { %300 = dma.done.wait [#allocation4], 256  }
 0x10b   :  { %301 = vsyncadd [#allocation4], 4294967040 }
 0x10c   :  { %178 = vsyncpa [#allocation3], 1 }
 0x10d   :  { %179 = vsyncpa [#allocation6], 1 }
 0x10e   :  { %180 = vsyncpa [#allocation4], 1 }

</bundles_post_ra>
